<compile_context>
chip_gen: v5e
topology: v5e:2x2
jax: 0.10.0
libtpu: 0.0.40
codegen_flags: <defaults>
</compile_context>

<pallas_src>
import jax
import jax.numpy as jnp
from jax.experimental import pallas as pl
from jax.experimental.pallas import tpu as pltpu

HIDDEN_STATE = 20  # `hidden_state` in the PyTorch module
LANE = 128         # TPU lane width


def _round_up(x, m):
    return (x + m - 1) // m * m


def _pg_kernel(x_ref, w1_ref, b1_ref, w2_ref, b2_ref, o_ref):
    # x: [TB, S]  w1: [S, Hp]  b1: [1, Hp]  w2: [Hp, A]  b2: [1, A]  o: [TB, A]
    x = x_ref[...]
    h = jnp.dot(x, w1_ref[...], preferred_element_type=jnp.float32) + b1_ref[...]
    h = jnp.maximum(h, 0.0)                                   # ReLU (VPU)
    out = jnp.dot(h, w2_ref[...], preferred_element_type=jnp.float32) + b2_ref[...]
    o_ref[...] = out.astype(o_ref.dtype)


def pad_params(w1, b1, w2, b2):
    """One-time parameter prep (call at init, reuse every forward step).

    Pads only the *hidden* dim to 128 lanes (zeros -> exact results); the
    action dim stays at its true width so the output writeback is narrow.
    Shapes returned: w1 [S, Hp], b1 [1, Hp], w2 [Hp, A], b2 [1, A].
    """
    f32 = jnp.float32
    state_dim, hidden = w1.shape
    action_dim = w2.shape[1]
    hidden_p = _round_up(hidden, LANE)

    w1_p = jnp.zeros((state_dim, hidden_p), f32).at[:, :hidden].set(w1.astype(f32))
    b1_p = jnp.zeros((1, hidden_p), f32).at[:, :hidden].set(
        b1.reshape(1, -1).astype(f32))
    w2_p = jnp.zeros((hidden_p, action_dim), f32).at[:hidden, :].set(w2.astype(f32))
    b2_p = b2.reshape(1, -1).astype(f32)
    return w1_p, b1_p, w2_p, b2_p


def pg_network_forward(x, w1_p, b1_p, w2_p, b2_p, *, block_batch=4096,
                       out_dtype=None):
    """Forward pass of PGNetwork: relu(x @ w1 + b1) @ w2 + b2.

    Expects params already prepared by pad_params(). The batch axis is tiled
    (sublane-aligned) and pipelined; weights/biases stay VMEM-resident.
    """
    batch, state_dim = x.shape
    hidden_p = w1_p.shape[1]
    action_dim = w2_p.shape[1]
    out_dtype = x.dtype if out_dtype is None else out_dtype

    # Sublane-aligned batch tile; ragged last block handled by Pallas (no
    # wrapper-side padding copy of x).
    tb = min(_round_up(block_batch, 8), _round_up(batch, 8))
    grid = (pl.cdiv(batch, tb),)

    out = pl.pallas_call(
        _pg_kernel,
        out_shape=jax.ShapeDtypeStruct((batch, action_dim), out_dtype),
        grid_spec=pltpu.PrefetchScalarGridSpec(
            num_scalar_prefetch=0,
            grid=grid,
            in_specs=[
                # batch-tiled activations
                pl.BlockSpec((tb, state_dim), lambda i: (i, 0)),
                # VMEM-resident params (constant index maps -> DMA'd once)
                pl.BlockSpec((state_dim, hidden_p), lambda i: (0, 0)),
                pl.BlockSpec((1, hidden_p), lambda i: (0, 0)),
                pl.BlockSpec((hidden_p, action_dim), lambda i: (0, 0)),
                pl.BlockSpec((1, action_dim), lambda i: (0, 0)),
            ],
            # Narrow (un-padded) output: last dim == full array dim, so the
            # writeback DMA only moves action_dim lanes per row.
            out_specs=pl.BlockSpec((tb, action_dim), lambda i: (i, 0)),
        ),
        compiler_params=pltpu.CompilerParams(
            dimension_semantics=("parallel",),   # batch sharding across TCs on v7x
        ),
    )(x, w1_p, b1_p, w2_p, b2_p)
    return out


def init_params(key, state_dim, action_dim):
    """Mirrors PGNetwork.initialize_weight(): weights ~ N(0, 0.1), bias = 0.01.
    Weights stored as [in, out] = transpose of PyTorch's [out, in]."""
    k1, k2 = jax.random.split(key)
    w1 = 0.1 * jax.random.normal(k1, (state_dim, HIDDEN_STATE), dtype=jnp.float32)
    b1 = jnp.full((1, HIDDEN_STATE), 0.01, dtype=jnp.float32)
    w2 = 0.1 * jax.random.normal(k2, (HIDDEN_STATE, action_dim), dtype=jnp.float32)
    b2 = jnp.full((1, action_dim), 0.01, dtype=jnp.float32)
    return w1, b1, w2, b2


if __name__ == "__main__":
    key = jax.random.PRNGKey(0)
    k_x, k_p = jax.random.split(key)

    # Small deterministic example; batch=24 with block_batch=8 exercises a
    # 3-step batch grid with VMEM-resident weights and a narrow output.
    batch, state_dim, action_dim = 24, 4, 2
    x = jax.random.normal(k_x, (batch, state_dim), dtype=jnp.float32)
    w1, b1, w2, b2 = init_params(k_p, state_dim, action_dim)

    # Pad/prep params once (hoisted out of the per-step forward).
    params = pad_params(w1, b1, w2, b2)

    out = pg_network_forward(x, *params, block_batch=8)
    out = jax.block_until_ready(out)

    # Reference in plain JAX (same math as the PyTorch forward).
    ref = jnp.maximum(x @ w1 + b1, 0.0) @ w2 + b2
    assert out.shape == (batch, action_dim)
    assert jnp.allclose(out, ref, atol=1e-5, rtol=1e-5)

    print("KERNEL_OK")
</pallas_src>

<mosaic_0001>
module attributes {stable_mosaic.version = 11 : i64} {
  func.func @_pg_kernel(%arg0: i32, %arg1: memref<8x4xf32, #tpu.memory_space<vmem>>, %arg2: memref<4x128xf32, #tpu.memory_space<vmem>>, %arg3: memref<1x128xf32, #tpu.memory_space<vmem>>, %arg4: memref<128x2xf32, #tpu.memory_space<vmem>>, %arg5: memref<1x2xf32, #tpu.memory_space<vmem>>, %arg6: memref<8x2xf32, #tpu.memory_space<vmem>>) attributes {dimension_semantics = [#tpu.dimension_semantics<parallel>], iteration_bounds = array<i64: 3>, scalar_prefetch = 0 : i64, scratch_operands = 0 : i64, tpu.core_type = #tpu.core_type<tc>, window_params = [{transform_indices = @transform_0, window_bounds = array<i64: 8, 4>}, {pipeline_mode = #tpu.pipeline_mode<synchronous>, transform_indices = @transform_1, window_bounds = array<i64: 4, 128>}, {pipeline_mode = #tpu.pipeline_mode<synchronous>, transform_indices = @transform_2, window_bounds = array<i64: 1, 128>}, {pipeline_mode = #tpu.pipeline_mode<synchronous>, transform_indices = @transform_3, window_bounds = array<i64: 128, 2>}, {pipeline_mode = #tpu.pipeline_mode<synchronous>, transform_indices = @transform_4, window_bounds = array<i64: 1, 2>}, {transform_indices = @transform_5, window_bounds = array<i64: 8, 2>}]} {
    %c0 = arith.constant 0 : index
    %c0_0 = arith.constant 0 : index
    %0 = vector.load %arg1[%c0, %c0_0] : memref<8x4xf32, #tpu.memory_space<vmem>>, vector<8x4xf32>
    %c0_1 = arith.constant 0 : index
    %c0_2 = arith.constant 0 : index
    %1 = vector.load %arg2[%c0_1, %c0_2] : memref<4x128xf32, #tpu.memory_space<vmem>>, vector<4x128xf32>
    %cst = arith.constant dense<0.000000e+00> : vector<8x128xf32>
    %2 = tpu.matmul %0, %1, %cst {dimension_numbers = #tpu.dot_dimension_numbers<[1], [0], [0], [1], [0, 0, 1, 1], [], []>} : vector<8x4xf32>, vector<4x128xf32>, vector<8x128xf32> -> vector<8x128xf32>
    %c0_3 = arith.constant 0 : index
    %c0_4 = arith.constant 0 : index
    %3 = vector.load %arg3[%c0_3, %c0_4] : memref<1x128xf32, #tpu.memory_space<vmem>>, vector<1x128xf32>
    %4 = vector.broadcast %3 : vector<1x128xf32> to vector<8x128xf32>
    %5 = arith.addf %2, %4 : vector<8x128xf32>
    %cst_5 = arith.constant 0.000000e+00 : f32
    %6 = vector.broadcast %cst_5 : f32 to vector<8x128xf32>
    %7 = arith.maximumf %5, %6 : vector<8x128xf32>
    %c0_6 = arith.constant 0 : index
    %c0_7 = arith.constant 0 : index
    %8 = vector.load %arg4[%c0_6, %c0_7] : memref<128x2xf32, #tpu.memory_space<vmem>>, vector<128x2xf32>
    %cst_8 = arith.constant dense<0.000000e+00> : vector<8x2xf32>
    %9 = tpu.matmul %7, %8, %cst_8 {dimension_numbers = #tpu.dot_dimension_numbers<[1], [0], [0], [1], [0, 0, 1, 1], [], []>} : vector<8x128xf32>, vector<128x2xf32>, vector<8x2xf32> -> vector<8x2xf32>
    %c0_9 = arith.constant 0 : index
    %c0_10 = arith.constant 0 : index
    %10 = vector.load %arg5[%c0_9, %c0_10] : memref<1x2xf32, #tpu.memory_space<vmem>>, vector<1x2xf32>
    %11 = vector.broadcast %10 : vector<1x2xf32> to vector<8x2xf32>
    %12 = arith.addf %9, %11 : vector<8x2xf32>
    %c0_11 = arith.constant 0 : index
    %c0_12 = arith.constant 0 : index
    %13 = vector.load %arg6[%c0_11, %c0_12] : memref<8x2xf32, #tpu.memory_space<vmem>>, vector<8x2xf32>
    tpu.vector_store %arg6[%c0_11, %c0_12], %12 {strides = array<i32>} : memref<8x2xf32, #tpu.memory_space<vmem>>, vector<8x2xf32>,
    return
  }
  func.func @transform_0(%arg0: i32) -> (i32, i32) {
    %c0_i32 = arith.constant 0 : i32
    %c0_i32_0 = arith.constant 0 : i32
    return %arg0, %c0_i32 : i32, i32
  }
  func.func @transform_1(%arg0: i32) -> (i32, i32) {
    %c0_i32 = arith.constant 0 : i32
    %c0_i32_0 = arith.constant 0 : i32
    %c0_i32_1 = arith.constant 0 : i32
    return %c0_i32, %c0_i32_0 : i32, i32
  }
  func.func @transform_2(%arg0: i32) -> (i32, i32) {
    %c0_i32 = arith.constant 0 : i32
    %c0_i32_0 = arith.constant 0 : i32
    %c0_i32_1 = arith.constant 0 : i32
    return %c0_i32, %c0_i32_0 : i32, i32
  }
  func.func @transform_3(%arg0: i32) -> (i32, i32) {
    %c0_i32 = arith.constant 0 : i32
    %c0_i32_0 = arith.constant 0 : i32
    %c0_i32_1 = arith.constant 0 : i32
    return %c0_i32, %c0_i32_0 : i32, i32
  }
  func.func @transform_4(%arg0: i32) -> (i32, i32) {
    %c0_i32 = arith.constant 0 : i32
    %c0_i32_0 = arith.constant 0 : i32
    %c0_i32_1 = arith.constant 0 : i32
    return %c0_i32, %c0_i32_0 : i32, i32
  }
  func.func @transform_5(%arg0: i32) -> (i32, i32) {
    %c0_i32 = arith.constant 0 : i32
    %c0_i32_0 = arith.constant 0 : i32
    return %arg0, %c0_i32 : i32, i32
  }
}

</mosaic_0001>

<bundles_post_ra>
// kernel: tpu_custom_call.1
= control target key start
LH: loop header
LB: loop body
LE: loop exit
PB: predicated region body
PF: predicated region fallthrough
CT: control target
= control target key end

     0   :  { %s409_s18 = smov 0   ;;  %s490_s0 = inlined_call_operand.vmem [shape: f32[24,4], index: 0, kind: input, shape index: {}]   ;;  %s491_s1 = inlined_call_operand.vmem [shape: f32[4,128], index: 1, kind: input, shape index: {}]   ;;  %s492_s2 = inlined_call_operand.vmem [shape: f32[1,128], index: 2, kind: input, shape index: {}]   ;;  %s493_s3 = inlined_call_operand.vmem [shape: f32[128,2], index: 3, kind: input, shape index: {}]   ;;  %s494_s4 = inlined_call_operand.vmem [shape: f32[1,2], index: 4, kind: input, shape index: {}]   ;;  %s495_s5 = inlined_call_operand.vmem [shape: f32[24,2], index: 5, kind: output, shape index: {}]  }
   0x1 LB: > { %s350_s19 = sadd.s32 4294967295, %s377_s18   ;;  %p354_p0 = scmp.ge.s32.totalorder %s377_s18, 1  ;;  %s377_s18 = sphi %s409_s18, %s15_s18  }
   0x2   : > { %p186_p1 = scmp.lt.s32.totalorder %s377_s18, 4 }
   0x4   : > { %p187_p2 = pnand %p354_p0, %p186_p1 }
   0x5   : > { %p212_p3 = scmp.lt.s32.totalorder (!%p187_p2), %s350_s19, 2 }
   0x6   : > { %190 = sbr.rel (%p187_p2) target bundleno = 274 (0x112), region = 40 }
   0xb   : > { %v221_v0 = vld [vmem:[%s491_s1] sm:$0xf]  ;;  %vm230_vm0 = vcmask 1043456   ;;  %v270_v1 = vld [vmem:[%s493_s3 + $0x78] sm:$0xff]  ;;  %v269_v2 = vld [vmem:[%s493_s3 + $0x70] sm:$0xff]  ;;  %s497_s19 = smov (!%p212_p3, %s350_s19), 2 }
   0xc   : > { %357 = vmatpush.msk.msra.mxu0 %vm230_vm0, %v221_v0  ;;  %275 = vmatpush.msra.mxu1 %v270_v1  ;;  %v268_v3 = vld [vmem:[%s493_s3 + $0x68] sm:$0xff]  ;;  %s355_s28 = sshll.u32 %s497_s19, 3  ;;  %vm226_vm1 = vcmask 31744   ;;  %v267_v4 = vld [vmem:[%s493_s3 + $0x60] sm:$0xff]  ;;  %v266_v6 = vld [vmem:[%s493_s3 + $0x58] sm:$0xff]  ;;  %vm295_vm2 = vcmask 15360  }
   0xd   : > { %s215_s8 = scalar_lea.vmem %s490_s0, %s355_s28  ;;  %v265_v7 = vld [vmem:[%s493_s3 + $0x50] sm:$0xff]  ;;  %v264_v8 = vld [vmem:[%s493_s3 + $0x48] sm:$0xff]  ;;  %v263_v9 = vld [vmem:[%s493_s3 + $0x40] sm:$0xff]  ;;  %s219_s17 = scalar_lea.vmem %s495_s5, %s355_s28 }
   0xe   : > { %276 = vmatpush.msra.mxu1 %v269_v2  ;;  %v220_v5 = vld [vmem:[%s215_s8] sm:$0xff]  ;;  %v262_v10 = vld [vmem:[%s493_s3 + $0x38] sm:$0xff]  ;;  %v261_v11 = vld [vmem:[%s493_s3 + $0x30] sm:$0xff] }
   0xf   : > { %358 = vmatmul.msk.f32.vlgmr.msra.gmra.mxu0 %vm226_vm1, %v220_v5  ;;  %v260_v12 = vld [vmem:[%s493_s3 + $0x28] sm:$0xff]  ;;  %v259_v13 = vld [vmem:[%s493_s3 + $0x20] sm:$0xff]  ;;  %v258_v14 = vld [vmem:[%s493_s3 + $0x18] sm:$0xff] }
  0x10   : > { %277 = vmatpush.msra.mxu1 %v268_v3  ;;  %v257_v15 = vld [vmem:[%s493_s3 + $0x10] sm:$0xff]  ;;  %v256_v16 = vld [vmem:[%s493_s3 + $0x8] sm:$0xff]  ;;  %v255_v17 = vld [vmem:[%s493_s3] sm:$0xff] }
  0x11   : > { %v369_v18 = vld [vmem:[%s492_s2] ss:$0 sm:$0xff] }
  0x12   : > { %278 = vmatpush.msra.mxu1 %v267_v4  ;;  %v370_v22 = vld [vmem:[%s494_s4] ss:$0 sm:$0xff] }
  0x14   : > { %279 = vmatpush.msra.mxu1 %v266_v6 }
  0x16   : > { %280 = vmatpush.msra.mxu1 %v265_v7 }
  0x18   : > { %281 = vmatpush.msra.mxu1 %v264_v8 }
  0x1a   : > { %282 = vmatpush.msra.mxu1 %v263_v9 }
  0x1c   : > { %283 = vmatpush.msra.mxu1 %v262_v10 }
  0x1e   : > { %284 = vmatpush.msra.mxu1 %v261_v11 }
  0x20   : > { %285 = vmatpush.msra.mxu1 %v260_v12 }
  0x22   : > { %286 = vmatpush.msra.mxu1 %v259_v13 }
  0x24   : > { %287 = vmatpush.msra.mxu1 %v258_v14 }
  0x26   : > { %288 = vmatpush.msra.mxu1 %v257_v15 }
  0x28   : > { %289 = vmatpush.msra.mxu1 %v256_v16 }
  0x2a   : > { %290 = vmatpush.msra.mxu1 %v255_v17 }
  0x8c   : > { %v251_v19 = vpop.f32.mrf.mxu0 }
  0x8d   : > { %v252_v20 = vadd.f32 %v369_v18, %v251_v19 }
  0x8f   : > { %v254_v21 = vmax.f32 %v252_v20, 0.0 }
  0x91   : > { %291 = vmatmul.f32.vlgmr.msra.gmra.mxu1 %v254_v21 }
 0x10e   : > { %v292_v23 = vpop.f32.mrf.mxu1 }
 0x10f   : > { %v293_v24 = vadd.f32 %v370_v22, %v292_v23 }
 0x111   : > { %296 = vst.msk [vmem:[%s219_s17] sm:$0xff] %vm295_vm2, %v293_v24 }
 0x112 PF: > { %s15_s18 = sadd.s32 1, %s377_s18  }
 0x113   : > { %p12_p4 = scmp.ge.s32.totalorder %s15_s18, 5  }
 0x115   :  { %14 = sbr.rel (!%p12_p4) target bundleno = 1 (0x1), region = 70 }

</bundles_post_ra>
